<compile_context>
chip_gen: v7x
topology: tpu7x:2x2x1
jax: 0.10.0
libtpu: 0.0.40
codegen_flags: <defaults>
</compile_context>

<pallas_src>
import functools

import jax
import jax.numpy as jnp
from jax.experimental import pallas as pl
from jax.experimental.pallas import tpu as pltpu


def _round_up(v, m):
    return ((v + m - 1) // m) * m


# ---------------------------------------------------------------------------
# Kernel 1: fused per-layer projection
#   yl = x @ Wl.T              (bf16 output -> cheap to stream in the N^2 pass)
#   ys = x @ Ws.T + b_total    (f32, consumed once at finalize)
# ---------------------------------------------------------------------------
def _proj_kernel(x_ref, w_ref, b_ref, yl_ref, ys_ref):
    fp = yl_ref.shape[1]
    y = jnp.dot(x_ref[...], w_ref[...], preferred_element_type=jnp.float32)
    yl_ref[...] = y[:, :fp].astype(jnp.bfloat16)
    ys_ref[...] = y[:, fp:] + b_ref[...]


def _project(x, col_block, w_packed, b_packed, *, tile):
    """x may be the layer-0 features or the JK slab; col_block selects the
    (block-index) feature column to read."""
    n_pad = x.shape[0]
    f_in_pad, two_fp = w_packed.shape
    fp = two_fp // 2
    return pl.pallas_call(
        _proj_kernel,
        out_shape=(jax.ShapeDtypeStruct((n_pad, fp), jnp.bfloat16),
                   jax.ShapeDtypeStruct((n_pad, fp), jnp.float32)),
        grid=(n_pad // tile,),
        in_specs=[
            pl.BlockSpec((tile, f_in_pad), lambda i: (i, col_block)),
            pl.BlockSpec((f_in_pad, two_fp), lambda i: (0, 0)),
            pl.BlockSpec((1, fp), lambda i: (0, 0)),
        ],
        out_specs=(pl.BlockSpec((tile, fp), lambda i: (i, 0)),
                   pl.BlockSpec((tile, fp), lambda i: (i, 0))),
        compiler_params=pltpu.CompilerParams(
            dimension_semantics=("parallel",)),
    )(x, w_packed, b_packed)


# ---------------------------------------------------------------------------
# Kernel 2: tiled neighborhood aggregation + finalize, writing into the JK slab
#   o[i_tile] += adj_i8[i_tile, k_tile] (bf16) @ yl[k_tile] (bf16)   (per k)
#   o[i_tile]  = relu(inv_deg * o + ys)                              (last k)
# The output block index is (i, layer): column block `layer` of the slab.
# ---------------------------------------------------------------------------
def _agg_kernel(adj_ref, yl_ref, ys_ref, invdeg_ref, slab_hbm_ref, o_ref, *,
                tk, resident_yl, apply_mean, apply_relu):
    del slab_hbm_ref  # aliased output buffer; never read in-kernel.
    k = pl.program_id(1)

    @pl.when(k == 0)
    def _init():
        o_ref[...] = jnp.zeros_like(o_ref)

    # int8 0/1 adjacency -> bf16 (exact); MXU runs native bf16 x bf16.
    adj = adj_ref[...].astype(jnp.float32).astype(jnp.bfloat16)
    if resident_yl:
        start = pl.multiple_of(k * tk, tk)
        yl = yl_ref[pl.ds(start, tk), :]
    else:
        yl = yl_ref[...]
    o_ref[...] += jnp.dot(adj, yl, preferred_element_type=jnp.float32)

    @pl.when(k == pl.num_programs(1) - 1)
    def _finalize():
        res = o_ref[...]
        if apply_mean:
            res = res * invdeg_ref[...]
        res = res + ys_ref[...]
        if apply_relu:
            res = jnp.maximum(res, 0.0)
        o_ref[...] = res


def _aggregate_into_slab(adj_i8, yl, ys, inv_deg, slab, *, layer, tile,
                         resident_yl, apply_mean, apply_relu, vmem_limit):
    n_pad = adj_i8.shape[0]
    fp = ys.shape[1]
    kern = functools.partial(_agg_kernel, tk=tile, resident_yl=resident_yl,
                             apply_mean=apply_mean, apply_relu=apply_relu)
    if resident_yl:
        # Constant block index -> the whole projected-feature matrix is fetched
        # once and stays VMEM-resident across all (i, k) steps.
        yl_spec = pl.BlockSpec((n_pad, fp), lambda i, k: (0, 0))
    else:
        yl_spec = pl.BlockSpec((tile, fp), lambda i, k: (k, 0))
    return pl.pallas_call(
        kern,
        out_shape=jax.ShapeDtypeStruct(slab.shape, jnp.float32),
        grid=(n_pad // tile, n_pad // tile),
        in_specs=[
            # adjacency tile, streamed over the reduction axis k (int8 in HBM)
            pl.BlockSpec((tile, tile), lambda i, k: (i, k)),
            yl_spec,
            # self term + folded biases, resident per row tile
            pl.BlockSpec((tile, fp), lambda i, k: (i, 0)),
            # per-row 1/in_degree (ones for 'sum'), resident per row tile
            pl.BlockSpec((tile, 1), lambda i, k: (i, 0)),
            # JK slab: aliased with the output, never DMA'd / read in-kernel
            pl.BlockSpec(memory_space=pl.ANY),
        ],
        out_specs=pl.BlockSpec((tile, fp), lambda i, k: (i, layer)),
        input_output_aliases={4: 0},
        compiler_params=pltpu.CompilerParams(
            dimension_semantics=("parallel", "arbitrary"),
            vmem_limit_bytes=vmem_limit),
    )(adj_i8, yl, ys, inv_deg, slab)


# ---------------------------------------------------------------------------
# Kernel 3: final JK linear on the concatenated-layer slab.
# ---------------------------------------------------------------------------
def _last_linear_kernel(x_ref, w_ref, b_ref, o_ref):
    y = jnp.dot(x_ref[...], w_ref[...], preferred_element_type=jnp.float32)
    o_ref[...] = (y + b_ref[...]).astype(o_ref.dtype)


def _last_linear(x, w, b, *, tile):
    n_pad, f_in = x.shape
    f_out = w.shape[1]
    return pl.pallas_call(
        _last_linear_kernel,
        out_shape=jax.ShapeDtypeStruct((n_pad, f_out), jnp.float32),
        grid=(n_pad // tile,),
        in_specs=[
            pl.BlockSpec((tile, f_in), lambda i: (i, 0)),
            pl.BlockSpec((f_in, f_out), lambda i: (0, 0)),
            pl.BlockSpec((1, f_out), lambda i: (0, 0)),
        ],
        out_specs=pl.BlockSpec((tile, f_out), lambda i: (i, 0)),
        compiler_params=pltpu.CompilerParams(
            dimension_semantics=("parallel",)),
    )(x, w, b)


# ---------------------------------------------------------------------------
# Parameter packing (one-time host-side glue): transpose to [Fin, Fout],
# zero-pad feature dims to multiples of 128, fold the three bias terms.
# ---------------------------------------------------------------------------
def pack_jknet_params(gconv_params, w_last, b_last, *, n_units, out_features,
                      lane=128):
    fp = _round_up(n_units, lane)

    packed_gconv = []
    for (w_lin, b_lin, w_self, b_self, bias) in gconv_params:
        f_out, f_in = w_lin.shape
        f_in_pad = _round_up(f_in, lane)
        w = jnp.zeros((f_in_pad, 2 * fp), jnp.float32)
        w = w.at[:f_in, :f_out].set(jnp.asarray(w_lin, jnp.float32).T)
        w = w.at[:f_in, fp:fp + f_out].set(jnp.asarray(w_self, jnp.float32).T)
        b = jnp.zeros((1, fp), jnp.float32)
        b = b.at[0, :f_out].set(
            jnp.asarray(b_lin + b_self + bias, jnp.float32))
        packed_gconv.append((w, b))

    n_layers = len(gconv_params)
    out_pad = _round_up(out_features, lane)
    w_last = jnp.asarray(w_last, jnp.float32)
    wl = jnp.zeros((n_layers * fp, out_pad), jnp.float32)
    for l in range(n_layers):
        blk = w_last[:, l * n_units:(l + 1) * n_units].T     # [n_units, out]
        wl = wl.at[l * fp:l * fp + n_units, :out_features].set(blk)
    bl = jnp.zeros((1, out_pad), jnp.float32)
    bl = bl.at[0, :out_features].set(jnp.asarray(b_last, jnp.float32))
    return packed_gconv, wl, bl


# ---------------------------------------------------------------------------
# Full JKNetConcat forward.
# ---------------------------------------------------------------------------
def jknet_concat_forward(adj, x, packed_gconv, w_last_packed, b_last_packed,
                         *, out_features, aggregation="sum", tile=512):
    if aggregation not in ("sum", "mean", "max"):
        raise ValueError("'aggregation' has to be 'sum', 'mean' or 'max'.")
    if aggregation == "max":
        # TODO(synk): 'max' mailbox aggregation has no dense-matmul form; only
        # 'sum' and 'mean' are implemented in the Pallas kernels.
        raise NotImplementedError("'max' aggregation not implemented")

    n, f_in = x.shape
    n_layers = len(packed_gconv)
    fp = packed_gconv[0][0].shape[1] // 2        # padded per-layer width
    f_in0_pad = packed_gconv[0][0].shape[0]      # padded input-feature width

    # One tile value for both grid axes (keeps n_pad % tile == 0 always).
    # Clamp so small graphs don't over-pad and, for v7x megacore, prefer >= 2
    # row tiles whenever the graph is big enough to split across TensorCores.
    tile = max(256, min(tile, max(256, _round_up(_round_up(n, 256) // 2, 256))))
    n_pad = _round_up(n, tile)

    adj_f = jnp.asarray(adj, jnp.float32)
    # TODO(synk): DGL leaves h == x for zero-in-degree nodes (no messages);
    # the dense-matmul form aggregates 0 for them instead.
    if aggregation == "mean":
        inv_deg = 1.0 / jnp.maximum(adj_f.sum(axis=1, keepdims=True), 1.0)
    else:
        inv_deg = jnp.ones((n, 1), jnp.float32)
    inv_deg = jnp.pad(inv_deg, ((0, n_pad - n), (0, 0)), constant_values=1.0)

    # 0/1 adjacency as int8 in HBM: 1 byte per edge slot of the N^2 stream.
    adj_i8 = jnp.zeros((n_pad, n_pad), jnp.int8)
    adj_i8 = adj_i8.at[:n, :n].set((adj_f != 0).astype(jnp.int8))

    x_pad = jnp.zeros((n_pad, f_in0_pad), jnp.float32)
    x_pad = x_pad.at[:n, :f_in].set(jnp.asarray(x, jnp.float32))

    # Keep the projected features fully VMEM-resident when they fit a budget
    # that is safe even on v7x's 64 MiB VMEM (bf16, possibly double-buffered).
    resident_yl = n_pad * fp * 2 <= (12 << 20)
    yl_vmem = (2 * n_pad * fp * 2) if resident_yl else (2 * tile * fp * 2)
    vmem_need = (2 * tile * tile          # adj int8, double-buffered
                 + yl_vmem                # projected features (bf16)
                 + 2 * tile * fp * 4      # ys self term (f32)
                 + 2 * tile * 4           # inv_deg
                 + 2 * tile * fp * 4)     # resident output accumulator block
    vmem_limit = int(min(max(vmem_need + (4 << 20), 32 << 20), 56 << 20))

    # Preallocated JK slab; each layer writes its output column block in place
    # (input_output_aliases), avoiding an XLA concat round-trip through HBM.
    slab = jnp.zeros((n_pad, n_layers * fp), jnp.float32)

    src, col = x_pad, 0
    apply_mean = aggregation == "mean"
    for l, (w_packed, b_packed) in enumerate(packed_gconv):
        yl, ys = _project(src, col, w_packed, b_packed, tile=tile)
        slab = _aggregate_into_slab(
            adj_i8, yl, ys, inv_deg, slab, layer=l, tile=tile,
            resident_yl=resident_yl, apply_mean=apply_mean, apply_relu=True,
            vmem_limit=vmem_limit)
        # TODO(synk): Dropout(0.5) is identity in eval mode; training-mode
        # random masking is not implemented in the kernel.
        src, col = slab, l   # next layer reads its input from slab column l

    out = _last_linear(slab, w_last_packed, b_last_packed, tile=tile)
    return out[:n, :out_features]


# ---------------------------------------------------------------------------
# Pure-JAX references (eval-mode forward of the PyTorch module).
#   emulate_bf16_yl=True mirrors the kernel's single bf16 rounding of h @ Wl.T
#   (everything else f32) for a tight correctness check.
# ---------------------------------------------------------------------------
def _reference_jknet(adj, x, gconv_params, w_last, b_last, aggregation, *,
                     emulate_bf16_yl=False):
    adj = jnp.asarray(adj, jnp.float32)
    if aggregation == "mean":
        a = adj / jnp.maximum(adj.sum(axis=1, keepdims=True), 1.0)
    else:
        a = adj
    h = jnp.asarray(x, jnp.float32)
    outs = []
    for (w_lin, b_lin, w_self, b_self, bias) in gconv_params:
        if emulate_bf16_yl:
            yl = (h @ w_lin.T).astype(jnp.bfloat16).astype(jnp.float32)
            pre = a @ yl + h @ w_self.T + b_lin + b_self + bias
        else:
            pre = (a @ h) @ w_lin.T + b_lin + h @ w_self.T + b_self + bias
        h = jnp.maximum(pre, 0.0)
        outs.append(h)
    return jnp.concatenate(outs, axis=1) @ w_last.T + b_last


if __name__ == "__main__":
    key = jax.random.PRNGKey(0)
    n_nodes = 200
    in_features, n_units, out_features, n_layers = 32, 16, 8, 6

    keys = jax.random.split(key, 2 + 4 * n_layers + 2)
    k_adj, k_x = keys[0], keys[1]
    layer_keys = keys[2:2 + 4 * n_layers]
    k_wl_last, k_bl_last = keys[-2], keys[-1]

    # Random directed graph (dense adjacency, adj[i, j] = 1 iff edge j -> i).
    adj = (jax.random.uniform(k_adj, (n_nodes, n_nodes)) < 0.1).astype(
        jnp.float32)
    x = jax.random.normal(k_x, (n_nodes, in_features), dtype=jnp.float32)

    # Deterministic parameter init (PyTorch Linear shapes: [out, in] / [out]).
    gconv_params = []
    f_in = in_features
    for li in range(n_layers):
        kw1, kb1, kw2, kb2 = layer_keys[4 * li:4 * li + 4]
        bound = 1.0 / (f_in ** 0.5)
        w_lin = jax.random.uniform(kw1, (n_units, f_in), minval=-bound,
                                   maxval=bound, dtype=jnp.float32)
        b_lin = jax.random.uniform(kb1, (n_units,), minval=-bound,
                                   maxval=bound, dtype=jnp.float32)
        w_self = jax.random.uniform(kw2, (n_units, f_in), minval=-bound,
                                    maxval=bound, dtype=jnp.float32)
        b_self = jax.random.uniform(kb2, (n_units,), minval=-bound,
                                    maxval=bound, dtype=jnp.float32)
        bias = jnp.zeros((n_units,), jnp.float32)  # nn.Parameter(zeros)
        gconv_params.append((w_lin, b_lin, w_self, b_self, bias))
        f_in = n_units

    bound = 1.0 / ((n_layers * n_units) ** 0.5)
    w_last = jax.random.uniform(k_wl_last, (out_features, n_layers * n_units),
                                minval=-bound, maxval=bound,
                                dtype=jnp.float32)
    b_last = jax.random.uniform(k_bl_last, (out_features,), minval=-bound,
                                maxval=bound, dtype=jnp.float32)

    packed_gconv, w_last_packed, b_last_packed = pack_jknet_params(
        gconv_params, w_last, b_last, n_units=n_units,
        out_features=out_features)

    for aggregation in ("sum", "mean"):
        out = jknet_concat_forward(
            adj, x, packed_gconv, w_last_packed, b_last_packed,
            out_features=out_features, aggregation=aggregation, tile=256)
        out = jax.block_until_ready(out)
        assert out.shape == (n_nodes, out_features)

        with jax.default_matmul_precision("highest"):
            ref = _reference_jknet(adj, x, gconv_params, w_last, b_last,
                                   aggregation)
            ref_q = _reference_jknet(adj, x, gconv_params, w_last, b_last,
                                     aggregation, emulate_bf16_yl=True)
        scale = jnp.maximum(jnp.max(jnp.abs(ref)), 1.0)
        # Tight check vs a reference that applies the same single bf16
        # rounding of the projected features the kernel uses.
        err_q = float(jnp.max(jnp.abs(out - ref_q)) / scale)
        # Looser check vs the exact f32 math (bf16 MXU feed of yl accumulates
        # ~2^-9 relative error per layer over 6 layers).
        err_exact = float(jnp.max(jnp.abs(out - ref)) / scale)
        assert err_q < 1e-2, f"{aggregation}: bf16-aware relative error {err_q}"
        assert err_exact < 3e-2, f"{aggregation}: relative error {err_exact}"

    print("KERNEL_OK")
</pallas_src>

<mosaic_0001>
module attributes {stable_mosaic.version = 11 : i64} {
  func.func @_proj_kernel(%arg0: i32, %arg1: memref<256x128xf32, #tpu.memory_space<vmem>>, %arg2: memref<128x256xf32, #tpu.memory_space<vmem>>, %arg3: memref<1x128xf32, #tpu.memory_space<vmem>>, %arg4: memref<256x128xbf16, #tpu.memory_space<vmem>>, %arg5: memref<256x128xf32, #tpu.memory_space<vmem>>) attributes {dimension_semantics = [#tpu.dimension_semantics<parallel>], iteration_bounds = array<i64: 1>, scalar_prefetch = 0 : i64, scratch_operands = 0 : i64, tpu.core_type = #tpu.core_type<tc>, window_params = [{transform_indices = @transform_0, window_bounds = array<i64: 256, 128>}, {pipeline_mode = #tpu.pipeline_mode<synchronous>, transform_indices = @transform_1, window_bounds = array<i64: 128, 256>}, {pipeline_mode = #tpu.pipeline_mode<synchronous>, transform_indices = @transform_2, window_bounds = array<i64: 1, 128>}, {transform_indices = @transform_3, window_bounds = array<i64: 256, 128>}, {transform_indices = @transform_4, window_bounds = array<i64: 256, 128>}]} {
    %c0 = arith.constant 0 : index
    %c0_0 = arith.constant 0 : index
    %0 = vector.load %arg1[%c0, %c0_0] : memref<256x128xf32, #tpu.memory_space<vmem>>, vector<256x128xf32>
    %c0_1 = arith.constant 0 : index
    %c0_2 = arith.constant 0 : index
    %1 = vector.load %arg2[%c0_1, %c0_2] : memref<128x256xf32, #tpu.memory_space<vmem>>, vector<128x256xf32>
    %cst = arith.constant dense<0.000000e+00> : vector<256x256xf32>
    %2 = tpu.matmul %0, %1, %cst {dimension_numbers = #tpu.dot_dimension_numbers<[1], [0], [0], [1], [0, 0, 1, 1], [], []>} : vector<256x128xf32>, vector<128x256xf32>, vector<256x256xf32> -> vector<256x256xf32>
    %3 = vector.extract_strided_slice %2 {offsets = [0, 0], sizes = [256, 128], strides = [1, 1]} : vector<256x256xf32> to vector<256x128xf32>
    %4 = arith.truncf %3 : vector<256x128xf32> to vector<256x128xbf16>
    %c0_3 = arith.constant 0 : index
    %c0_4 = arith.constant 0 : index
    %5 = vector.load %arg4[%c0_3, %c0_4] : memref<256x128xbf16, #tpu.memory_space<vmem>>, vector<256x128xbf16>
    tpu.vector_store %arg4[%c0_3, %c0_4], %4 {strides = array<i32>} : memref<256x128xbf16, #tpu.memory_space<vmem>>, vector<256x128xbf16>,
    %6 = vector.extract_strided_slice %2 {offsets = [0, 128], sizes = [256, 128], strides = [1, 1]} : vector<256x256xf32> to vector<256x128xf32>
    %c0_5 = arith.constant 0 : index
    %c0_6 = arith.constant 0 : index
    %7 = vector.load %arg3[%c0_5, %c0_6] : memref<1x128xf32, #tpu.memory_space<vmem>>, vector<1x128xf32>
    %8 = vector.broadcast %7 : vector<1x128xf32> to vector<256x128xf32>
    %9 = arith.addf %6, %8 : vector<256x128xf32>
    %c0_7 = arith.constant 0 : index
    %c0_8 = arith.constant 0 : index
    %10 = vector.load %arg5[%c0_7, %c0_8] : memref<256x128xf32, #tpu.memory_space<vmem>>, vector<256x128xf32>
    tpu.vector_store %arg5[%c0_7, %c0_8], %9 {strides = array<i32>} : memref<256x128xf32, #tpu.memory_space<vmem>>, vector<256x128xf32>,
    return
  }
  func.func @transform_0(%arg0: i32) -> (i32, i32) {
    %c0_i32 = arith.constant 0 : i32
    %c0_i32_0 = arith.constant 0 : i32
    return %arg0, %c0_i32 : i32, i32
  }
  func.func @transform_1(%arg0: i32) -> (i32, i32) {
    %c0_i32 = arith.constant 0 : i32
    %c0_i32_0 = arith.constant 0 : i32
    %c0_i32_1 = arith.constant 0 : i32
    return %c0_i32, %c0_i32_0 : i32, i32
  }
  func.func @transform_2(%arg0: i32) -> (i32, i32) {
    %c0_i32 = arith.constant 0 : i32
    %c0_i32_0 = arith.constant 0 : i32
    %c0_i32_1 = arith.constant 0 : i32
    return %c0_i32, %c0_i32_0 : i32, i32
  }
  func.func @transform_3(%arg0: i32) -> (i32, i32) {
    %c0_i32 = arith.constant 0 : i32
    %c0_i32_0 = arith.constant 0 : i32
    return %arg0, %c0_i32 : i32, i32
  }
  func.func @transform_4(%arg0: i32) -> (i32, i32) {
    %c0_i32 = arith.constant 0 : i32
    %c0_i32_0 = arith.constant 0 : i32
    return %arg0, %c0_i32 : i32, i32
  }
}

</mosaic_0001>

<bundles_post_ra>
// kernel: tpu_custom_call.1
= control target key start
LH: loop header
LB: loop body
LE: loop exit
PB: predicated region body
PF: predicated region fallthrough
CT: control target
= control target key end

     0   :  { %10 = vsyncpa [#allocation3], 0  ;;  %s1120_s0 = inlined_call_operand.hbm [shape: f32[256,128], index: 0, kind: input, shape index: {}]   ;;  %s1121_s1 = inlined_call_operand.hbm [shape: f32[128,256], index: 1, kind: input, shape index: {}]   ;;  %s1122_s2 = inlined_call_operand.vmem [shape: f32[1,128], index: 2, kind: input, shape index: {}]   ;;  %s1123_s3 = inlined_call_operand.hbm [shape: bf16[256,128], index: 3, kind: output, shape index: {0}]   ;;  %s1124_s4 = inlined_call_operand.hbm [shape: f32[256,128], index: 4, kind: output, shape index: {1}]  }
   0x1   :  { %11 = vsyncpa [#allocation6], 0 }
   0x2   :  { %12 = vsyncpa [#allocation4], 0 }
   0x3   :  { %13 = vsyncpa [#allocation9], 0  ;;  %s947_s15 = smov [#allocation2]   ;;  %s851_s19 = scalar_lea.hbm %s1120_s0, 4096 }
   0x4   :  { %s19_s16 = sshll.u32 %s947_s15, 4  ;;  %p852_p0 = scmp.ne.s32.totalorder %s1120_s0, %s851_s19  ;;  %s20_s16 = int_to_ptr.vmem [resolvable:$true] %s19_s16 }
   0x5   :  { %p855_p1 = scmp.lt.u32.totalorder %s851_s19, %s1120_s0 }
   0x7   :  { %p857_p2 = pnand %p855_p1, %p852_p0 }
   0x9   :  { %860 = shalt.err (!%p857_p2)
}
   0xa   :  { %s861_s24 = scalar_lea.vmem %s20_s16, 4096  ;;  %p866_p4 = scmp.lt.s32.totalorder %s20_s16, %s20_s16 }
   0xb   :  { %p862_p3 = scmp.ne.s32.totalorder %s20_s16, %s861_s24  ;;  %p867_p5 = scmp.lt.s32.totalorder %s861_s24, %s861_s24 }
   0xd   :  { %p868_p6 = por %p867_p5, %p866_p4 }
   0xf   :  { %p869_p7 = pnand %p868_p6, %p862_p3 }
  0x11   :  { %872 = shalt.err (!%p869_p7)
}
  0x12   :  { %s948_s25 = smov 128   ;;  %s949_s26 = smov 8  }
  0x13   :  { %25 = dma.hbm_to_vmem [thread:$0]  %s1120_s0, 4096, %s20_s16, [#allocation3], %s948_s25, %s948_s25, %s949_s26  }
  0x14   :  { %s950_s29 = smov [#allocation5]   ;;  %s873_s7 = scalar_lea.hbm %s1121_s1, 4096 }
  0x15   :  { %s31_s30 = sshll.u32 %s950_s29, 4  ;;  %p874_p8 = scmp.ne.s32.totalorder %s1121_s1, %s873_s7  ;;  %s32_s30 = int_to_ptr.vmem [resolvable:$true] %s31_s30 }
  0x16   :  { %p877_p9 = scmp.lt.u32.totalorder %s873_s7, %s1121_s1 }
  0x18   :  { %p879_p10 = pnand %p877_p9, %p874_p8 }
  0x1a   :  { %882 = shalt.err (!%p879_p10)
}
  0x1b   :  { %s883_s12 = scalar_lea.vmem %s32_s30, 4096  ;;  %p888_p12 = scmp.lt.s32.totalorder %s32_s30, %s32_s30 }
  0x1c   :  { %p884_p11 = scmp.ne.s32.totalorder %s32_s30, %s883_s12  ;;  %p889_p13 = scmp.lt.s32.totalorder %s883_s12, %s883_s12 }
  0x1e   :  { %p890_p0 = por %p889_p13, %p888_p12 }
  0x20   :  { %p891_p1 = pnand %p890_p0, %p884_p11 }
  0x22   :  { %894 = shalt.err (!%p891_p1)
}
  0x23   :  { %s951_s0 = smov 256   ;;  %s952_s13 = smov 16  }
  0x24   :  { %37 = dma.hbm_to_vmem [thread:$0]  %s1121_s1, 4096, %s32_s30, [#allocation6], %s951_s0, %s951_s0, %s952_s13  }
  0x25   :  { %939 = dma.done.wait [#allocation3], 4096  }
  0x26   :  { %940 = vsyncadd [#allocation3], 4294963200 }
  0x27   :  { %941 = dma.done.wait [#allocation6], 4096  }
  0x28   :  { %942 = vsyncadd [#allocation6], 4294963200  ;;  %v953_v0 = vmov 0.0   ;;  %v79_v1 = vld [vmem:[#allocation5 + $0x8] sm:$0xff]  ;;  %v81_v2 = vld [vmem:[#allocation5 + $0x18] sm:$0xff]  ;;  %s955_s18 = smov [#allocation8]  }
  0x29   :  { %174 = vmatprep.mubr.f32.mxu0 %v953_v0  ;;  %270 = vmatprep.mubr.f32.mxu1 %v953_v0  ;;  %v78_v3 = vld [vmem:[#allocation5] sm:$0xff]  ;;  %v792_v4 = vpack.c.bf16 %v81_v2, %v79_v1  ;;  %v80_v5 = vld [vmem:[#allocation5 + $0x10] sm:$0xff]  ;;  %v83_v6 = vld [vmem:[#allocation5 + $0x28] sm:$0xff]  ;;  %s615_s19 = sshll.u32 %s955_s18, 4  ;;  %s1081_s19 = int_to_ptr.vmem [resolvable:$true] %s615_s19 }
  0x2a   :  { %v85_v7 = vld [vmem:[#allocation5 + $0x38] sm:$0xff]  ;;  %v794_v8 = vpack.c.bf16 %v80_v5, %v78_v3  ;;  %v82_v10 = vld [vmem:[#allocation5 + $0x20] sm:$0xff]  ;;  %v84_v11 = vld [vmem:[#allocation5 + $0x30] sm:$0xff] }
  0x2b   :  { %v796_v9 = vpack.c.bf16 %v85_v7, %v83_v6  ;;  %v87_v12 = vld [vmem:[#allocation5 + $0x48] sm:$0xff]  ;;  %793 = vmatprep.subr.bf16.mxu0 %v792_v4  ;;  %824 = vmatprep.subr.bf16.mxu1 %v792_v4  ;;  %v89_v13 = vld [vmem:[#allocation5 + $0x58] sm:$0xff]  ;;  %v798_v14 = vpack.c.bf16 %v84_v11, %v82_v10  ;;  %v86_v16 = vld [vmem:[#allocation5 + $0x40] sm:$0xff] }
  0x2c   :  { %795 = vmatpush1.bf16.msra.mxu0 %v794_v8  ;;  %832 = vmatpush1.bf16.msra.mxu1 %v794_v8  ;;  %v800_v15 = vpack.c.bf16 %v89_v13, %v87_v12  ;;  %v88_v17 = vld [vmem:[#allocation5 + $0x50] sm:$0xff]  ;;  %v91_v18 = vld [vmem:[#allocation5 + $0x68] sm:$0xff]  ;;  %v93_v19 = vld [vmem:[#allocation5 + $0x78] sm:$0xff] }
  0x2d   :  { %797 = vmatprep.subr.bf16.mxu0 %v796_v9  ;;  %825 = vmatprep.subr.bf16.mxu1 %v796_v9  ;;  %v802_v20 = vpack.c.bf16 %v88_v17, %v86_v16  ;;  %v804_v21 = vpack.c.bf16 %v93_v19, %v91_v18  ;;  %v90_v22 = vld [vmem:[#allocation5 + $0x60] sm:$0xff]  ;;  %v92_v23 = vld [vmem:[#allocation5 + $0x70] sm:$0xff]  ;;  %v95_v24 = vld [vmem:[#allocation5 + $0x88] sm:$0xff] }
  0x2e   :  { %v97_v25 = vld [vmem:[#allocation5 + $0x98] sm:$0xff]  ;;  %v806_v26 = vpack.c.bf16 %v92_v23, %v90_v22  ;;  %v94_v28 = vld [vmem:[#allocation5 + $0x80] sm:$0xff]  ;;  %v96_v29 = vld [vmem:[#allocation5 + $0x90] sm:$0xff] }
  0x2f   :  { %v808_v27 = vpack.c.bf16 %v97_v25, %v95_v24  ;;  %v99_v30 = vld [vmem:[#allocation5 + $0xa8] sm:$0xff]  ;;  %v101_v31 = vld [vmem:[#allocation5 + $0xb8] sm:$0xff]  ;;  %v810_v32 = vpack.c.bf16 %v96_v29, %v94_v28  ;;  %v98_v34 = vld [vmem:[#allocation5 + $0xa0] sm:$0xff] }
  0x30   :  { %799 = vmatpush1.bf16.msra.mxu0 %v798_v14  ;;  %833 = vmatpush1.bf16.msra.mxu1 %v798_v14  ;;  %v812_v33 = vpack.c.bf16 %v101_v31, %v99_v30  ;;  %v100_v35 = vld [vmem:[#allocation5 + $0xb0] sm:$0xff]  ;;  %v103_v36 = vld [vmem:[#allocation5 + $0xc8] sm:$0xff]  ;;  %v105_v37 = vld [vmem:[#allocation5 + $0xd8] sm:$0xff] }
  0x31   :  { %801 = vmatprep.subr.bf16.mxu0 %v800_v15  ;;  %826 = vmatprep.subr.bf16.mxu1 %v800_v15  ;;  %v814_v38 = vpack.c.bf16 %v100_v35, %v98_v34  ;;  %v816_v39 = vpack.c.bf16 %v105_v37, %v103_v36  ;;  %v102_v40 = vld [vmem:[#allocation5 + $0xc0] sm:$0xff]  ;;  %v104_v41 = vld [vmem:[#allocation5 + $0xd0] sm:$0xff]  ;;  %v107_v42 = vld [vmem:[#allocation5 + $0xe8] sm:$0xff] }
  0x32   :  { %v109_v43 = vld [vmem:[#allocation5 + $0xf8] sm:$0xff]  ;;  %v818_v44 = vpack.c.bf16 %v104_v41, %v102_v40  ;;  %v106_v46 = vld [vmem:[#allocation5 + $0xe0] sm:$0xff]  ;;  %v108_v47 = vld [vmem:[#allocation5 + $0xf0] sm:$0xff] }
  0x33   :  { %v820_v45 = vpack.c.bf16 %v109_v43, %v107_v42  ;;  %v822_v48 = vpack.c.bf16 %v108_v47, %v106_v46  ;;  %v46_v49 = vld [vmem:[#allocation2] sm:$0xff]  ;;  %v47_v51 = vld [vmem:[#allocation2 + $0x8] sm:$0xff]  ;;  %v48_v53 = vld [vmem:[#allocation2 + $0x10] sm:$0xff] }
  0x34   :  { %803 = vmatpush1.bf16.msra.mxu0 %v802_v20  ;;  %834 = vmatpush1.bf16.msra.mxu1 %v802_v20  ;;  %v62_v50 = vld [vmem:[#allocation2 + $0x80] sm:$0xff]  ;;  %v63_v52 = vld [vmem:[#allocation2 + $0x88] sm:$0xff]  ;;  %v64_v54 = vld [vmem:[#allocation2 + $0x90] sm:$0xff] }
  0x35   :  { %805 = vmatprep.subr.bf16.mxu0 %v804_v21  ;;  %827 = vmatprep.subr.bf16.mxu1 %v804_v21  ;;  %v49_v55 = vld [vmem:[#allocation2 + $0x18] sm:$0xff]  ;;  %v50_v57 = vld [vmem:[#allocation2 + $0x20] sm:$0xff]  ;;  %v51_v59 = vld [vmem:[#allocation2 + $0x28] sm:$0xff] }
  0x36   :  { %v65_v56 = vld [vmem:[#allocation2 + $0x98] sm:$0xff]  ;;  %v66_v58 = vld [vmem:[#allocation2 + $0xa0] sm:$0xff]  ;;  %v67_v60 = vld [vmem:[#allocation2 + $0xa8] sm:$0xff] }
  0x37   :  { %v52_v61 = vld [vmem:[#allocation2 + $0x30] sm:$0xff]  ;;  %v53_v63 = vld [vmem:[#allocation2 + $0x38] sm:$0xff]  ;;  %v54_v2 = vld [vmem:[#allocation2 + $0x40] sm:$0xff] }
  0x38   :  { %807 = vmatpush1.bf16.msra.mxu0 %v806_v26  ;;  %835 = vmatpush1.bf16.msra.mxu1 %v806_v26  ;;  %v68_v62 = vld [vmem:[#allocation2 + $0xb0] sm:$0xff]  ;;  %v69_v1 = vld [vmem:[#allocation2 + $0xb8] sm:$0xff]  ;;  %v70_v3 = vld [vmem:[#allocation2 + $0xc0] sm:$0xff] }
  0x39   :  { %809 = vmatprep.subr.bf16.mxu0 %v808_v27  ;;  %828 = vmatprep.subr.bf16.mxu1 %v808_v27  ;;  %v55_v4 = vld [vmem:[#allocation2 + $0x48] sm:$0xff]  ;;  %v56_v6 = vld [vmem:[#allocation2 + $0x50] sm:$0xff]  ;;  %v57_v8 = vld [vmem:[#allocation2 + $0x58] sm:$0xff] }
  0x3a   :  { %v71_v5 = vld [vmem:[#allocation2 + $0xc8] sm:$0xff]  ;;  %v72_v7 = vld [vmem:[#allocation2 + $0xd0] sm:$0xff]  ;;  %v73_v9 = vld [vmem:[#allocation2 + $0xd8] sm:$0xff] }
  0x3b   :  { %v58_v10 = vld [vmem:[#allocation2 + $0x60] sm:$0xff]  ;;  %v59_v12 = vld [vmem:[#allocation2 + $0x68] sm:$0xff]  ;;  %v60_v14 = vld [vmem:[#allocation2 + $0x70] sm:$0xff] }
  0x3c   :  { %811 = vmatpush1.bf16.msra.mxu0 %v810_v32  ;;  %836 = vmatpush1.bf16.msra.mxu1 %v810_v32  ;;  %v74_v11 = vld [vmem:[#allocation2 + $0xe0] sm:$0xff]  ;;  %v75_v13 = vld [vmem:[#allocation2 + $0xe8] sm:$0xff]  ;;  %v76_v15 = vld [vmem:[#allocation2 + $0xf0] sm:$0xff] }
  0x3d   :  { %813 = vmatprep.subr.bf16.mxu0 %v812_v33  ;;  %829 = vmatprep.subr.bf16.mxu1 %v812_v33  ;;  %v61_v16 = vld [vmem:[#allocation2 + $0x78] sm:$0xff]  ;;  %v1045_v18 = vld [vmem:[%s1122_s2] ss:$0 sm:$0xff]  ;;  %s954_s2 = smov [#allocation7]  }
  0x3e   :  { %v77_v17 = vld [vmem:[#allocation2 + $0xf8] sm:$0xff]  ;;  %s603_s17 = sshll.u32 %s954_s2, 4  ;;  %s1077_s17 = int_to_ptr.vmem [resolvable:$true] %s603_s17 }
  0x3f   :  { %s895_s20 = scalar_lea.vmem %s1077_s17, 2048  ;;  %p900_p3 = scmp.lt.s32.totalorder %s1077_s17, %s1077_s17 }
  0x40   :  { %815 = vmatpush1.bf16.msra.mxu0 %v814_v38  ;;  %837 = vmatpush1.bf16.msra.mxu1 %v814_v38  ;;  %p896_p2 = scmp.ne.s32.totalorder %s1077_s17, %s895_s20  ;;  %p901_p4 = scmp.lt.s32.totalorder %s895_s20, %s895_s20 }
  0x41   :  { %817 = vmatprep.subr.bf16.mxu0 %v816_v39  ;;  %830 = vmatprep.subr.bf16.mxu1 %v816_v39 }
  0x42   :  { %p902_p5 = por %p901_p4, %p900_p3 }
  0x44   :  { %819 = vmatpush1.bf16.msra.mxu0 %v818_v44  ;;  %838 = vmatpush1.bf16.msra.mxu1 %v818_v44  ;;  %p903_p6 = pnand %p902_p5, %p896_p2 }
  0x45   :  { %821 = vmatprep.subr.bf16.mxu0 %v820_v45  ;;  %831 = vmatprep.subr.bf16.mxu1 %v820_v45 }
  0x48   :  { %823 = vmatpush1.bf16.msra.mxu0 %v822_v48  ;;  %839 = vmatpush1.bf16.msra.mxu1 %v822_v48 }
  0x4b   :  { %175 = vmatmul.mubr.f32.vlgmr.msra.gmra.mrb[0].mxu0 %v46_v49  ;;  %271 = vmatmul.mubr.f32.vlgmr.msra.gmra.mrb[0].mxu1 %v62_v50 }
  0x4c   :  { %180 = vmatprep.mubr.f32.mxu0 %v953_v0  ;;  %276 = vmatprep.mubr.f32.mxu1 %v953_v0 }
  0x4f   :  { %181 = vmatmul.mubr.f32.gmra.mrb[2].mxu0 %v47_v51  ;;  %277 = vmatmul.mubr.f32.gmra.mrb[2].mxu1 %v63_v52 }
  0x50   :  { %186 = vmatprep.mubr.f32.mxu0 %v953_v0  ;;  %282 = vmatprep.mubr.f32.mxu1 %v953_v0 }
  0x53   :  { %187 = vmatmul.mubr.f32.gmra.mrb[4].mxu0 %v48_v53  ;;  %283 = vmatmul.mubr.f32.gmra.mrb[4].mxu1 %v64_v54 }
  0x54   :  { %192 = vmatprep.mubr.f32.mxu0 %v953_v0  ;;  %288 = vmatprep.mubr.f32.mxu1 %v953_v0 }
  0x57   :  { %193 = vmatmul.mubr.f32.gmra.mrb[6].mxu0 %v49_v55  ;;  %289 = vmatmul.mubr.f32.gmra.mrb[6].mxu1 %v65_v56 }
  0x58   :  { %198 = vmatprep.mubr.f32.mxu0 %v953_v0  ;;  %294 = vmatprep.mubr.f32.mxu1 %v953_v0 }
  0x5b   :  { %199 = vmatmul.mubr.f32.gmra.mrb[8].mxu0 %v50_v57  ;;  %295 = vmatmul.mubr.f32.gmra.mrb[8].mxu1 %v66_v58 }
  0x5c   :  { %204 = vmatprep.mubr.f32.mxu0 %v953_v0  ;;  %300 = vmatprep.mubr.f32.mxu1 %v953_v0 }
  0x5f   :  { %205 = vmatmul.mubr.f32.gmra.mrb[10].mxu0 %v51_v59  ;;  %301 = vmatmul.mubr.f32.gmra.mrb[10].mxu1 %v67_v60 }
  0x60   :  { %210 = vmatprep.mubr.f32.mxu0 %v953_v0  ;;  %306 = vmatprep.mubr.f32.mxu1 %v953_v0 }
  0x63   :  { %211 = vmatmul.mubr.f32.gmra.mrb[12].mxu0 %v52_v61  ;;  %307 = vmatmul.mubr.f32.gmra.mrb[12].mxu1 %v68_v62 }
  0x64   :  { %216 = vmatprep.mubr.f32.mxu0 %v953_v0  ;;  %312 = vmatprep.mubr.f32.mxu1 %v953_v0 }
  0x67   :  { %217 = vmatmul.mubr.f32.gmra.mrb[14].mxu0 %v53_v63  ;;  %313 = vmatmul.mubr.f32.gmra.mrb[14].mxu1 %v69_v1 }
  0x68   :  { %222 = vmatprep.mubr.f32.mxu0 %v953_v0  ;;  %318 = vmatprep.mubr.f32.mxu1 %v953_v0 }
  0x6b   :  { %223 = vmatmul.mubr.f32.gmra.mrb[16].mxu0 %v54_v2  ;;  %319 = vmatmul.mubr.f32.gmra.mrb[16].mxu1 %v70_v3 }
  0x6c   :  { %228 = vmatprep.mubr.f32.mxu0 %v953_v0  ;;  %324 = vmatprep.mubr.f32.mxu1 %v953_v0 }
  0x6f   :  { %229 = vmatmul.mubr.f32.gmra.mrb[18].mxu0 %v55_v4  ;;  %325 = vmatmul.mubr.f32.gmra.mrb[18].mxu1 %v71_v5 }
  0x70   :  { %234 = vmatprep.mubr.f32.mxu0 %v953_v0  ;;  %330 = vmatprep.mubr.f32.mxu1 %v953_v0 }
  0x73   :  { %235 = vmatmul.mubr.f32.gmra.mrb[20].mxu0 %v56_v6  ;;  %331 = vmatmul.mubr.f32.gmra.mrb[20].mxu1 %v72_v7 }
  0x74   :  { %240 = vmatprep.mubr.f32.mxu0 %v953_v0  ;;  %336 = vmatprep.mubr.f32.mxu1 %v953_v0 }
  0x77   :  { %241 = vmatmul.mubr.f32.gmra.mrb[22].mxu0 %v57_v8  ;;  %337 = vmatmul.mubr.f32.gmra.mrb[22].mxu1 %v73_v9 }
  0x78   :  { %246 = vmatprep.mubr.f32.mxu0 %v953_v0  ;;  %342 = vmatprep.mubr.f32.mxu1 %v953_v0 }
  0x7b   :  { %247 = vmatmul.mubr.f32.gmra.mrb[24].mxu0 %v58_v10  ;;  %343 = vmatmul.mubr.f32.gmra.mrb[24].mxu1 %v74_v11 }
  0x7c   :  { %252 = vmatprep.mubr.f32.mxu0 %v953_v0  ;;  %348 = vmatprep.mubr.f32.mxu1 %v953_v0 }
  0x7f   :  { %253 = vmatmul.mubr.f32.gmra.mrb[26].mxu0 %v59_v12  ;;  %349 = vmatmul.mubr.f32.gmra.mrb[26].mxu1 %v75_v13 }
  0x80   :  { %258 = vmatprep.mubr.f32.mxu0 %v953_v0  ;;  %354 = vmatprep.mubr.f32.mxu1 %v953_v0 }
  0x83   :  { %259 = vmatmul.mubr.f32.gmra.mrb[28].mxu0 %v60_v14  ;;  %355 = vmatmul.mubr.f32.gmra.mrb[28].mxu1 %v76_v15 }
  0x84   :  { %264 = vmatprep.mubr.f32.mxu0 %v953_v0  ;;  %360 = vmatprep.mubr.f32.mxu1 %v953_v0 }
  0x87   :  { %265 = vmatmul.mubr.f32.gmra.mrb[30].mxu0 %v61_v16  ;;  %361 = vmatmul.mubr.f32.gmra.mrb[30].mxu1 %v77_v17 }
 0x11e   :  { %v176_v19 = vpop.f32.mrb[0].mxu0  ;;  %v272_v20 = vpop.f32.mrb[0].mxu1 }
 0x11f   :  { %v178_v21 = vpop.f32.mrb[1].mxu0  ;;  %v274_v22 = vpop.f32.mrb[1].mxu1 }
 0x120   :  { %v534_v23 = vadd.f32 %v1045_v18, %v178_v21  ;;  %v550_v24 = vadd.f32 %v1045_v18, %v274_v22 }
 0x122   :  { %566 = vst [vmem:[#allocation8] sm:$0xff] %v534_v23  ;;  %582 = vst [vmem:[#allocation8 + $0x80] sm:$0xff] %v550_v24  ;;  %v182_v0 = vpop.f32.mrb[2].mxu0  ;;  %v278_v25 = vpop.f32.mrb[2].mxu1 }
 0x123   :  { %v700_v26 = vpack.c.bf16 %v182_v0, %v176_v19  ;;  %v740_v27 = vpack.c.bf16 %v278_v25, %v272_v20  ;;  %v184_v28 = vpop.f32.mrb[3].mxu0  ;;  %v280_v29 = vpop.f32.mrb[3].mxu1 }
 0x124   :  { %v535_v30 = vadd.f32 %v1045_v18, %v184_v28  ;;  %v551_v31 = vadd.f32 %v1045_v18, %v280_v29 }
 0x125   :  { %701 = vst [vmem:[#allocation7] sm:$0xff] %v700_v26   ;;  %784 = vst [vmem:[#allocation7 + $0x40] sm:$0xff] %v740_v27  }
 0x126   :  { %567 = vst [vmem:[#allocation8 + $0x8] sm:$0xff] %v535_v30  ;;  %583 = vst [vmem:[#allocation8 + $0x88] sm:$0xff] %v551_v31  ;;  %v188_v32 = vpop.f32.mrb[4].mxu0  ;;  %v284_v33 = vpop.f32.mrb[4].mxu1 }
 0x127   :  { %v190_v34 = vpop.f32.mrb[5].mxu0  ;;  %v286_v35 = vpop.f32.mrb[5].mxu1 }
 0x128   :  { %v536_v36 = vadd.f32 %v1045_v18, %v190_v34  ;;  %v552_v37 = vadd.f32 %v1045_v18, %v286_v35 }
 0x12a   :  { %568 = vst [vmem:[#allocation8 + $0x10] sm:$0xff] %v536_v36  ;;  %584 = vst [vmem:[#allocation8 + $0x90] sm:$0xff] %v552_v37  ;;  %v194_v38 = vpop.f32.mrb[6].mxu0  ;;  %v290_v39 = vpop.f32.mrb[6].mxu1 }
 0x12b   :  { %v705_v40 = vpack.c.bf16 %v194_v38, %v188_v32  ;;  %v745_v41 = vpack.c.bf16 %v290_v39, %v284_v33  ;;  %v196_v42 = vpop.f32.mrb[7].mxu0  ;;  %v292_v43 = vpop.f32.mrb[7].mxu1 }
 0x12c   :  { %v537_v44 = vadd.f32 %v1045_v18, %v196_v42  ;;  %v553_v45 = vadd.f32 %v1045_v18, %v292_v43 }
 0x12d   :  { %777 = vst [vmem:[#allocation7 + $0x8] sm:$0xff] %v705_v40   ;;  %785 = vst [vmem:[#allocation7 + $0x48] sm:$0xff] %v745_v41  }
 0x12e   :  { %569 = vst [vmem:[#allocation8 + $0x18] sm:$0xff] %v537_v44  ;;  %585 = vst [vmem:[#allocation8 + $0x98] sm:$0xff] %v553_v45  ;;  %v200_v46 = vpop.f32.mrb[8].mxu0  ;;  %v296_v47 = vpop.f32.mrb[8].mxu1 }
 0x12f   :  { %v202_v48 = vpop.f32.mrb[9].mxu0  ;;  %v298_v49 = vpop.f32.mrb[9].mxu1 }
 0x130   :  { %v538_v50 = vadd.f32 %v1045_v18, %v202_v48  ;;  %v554_v51 = vadd.f32 %v1045_v18, %v298_v49 }
 0x132   :  { %570 = vst [vmem:[#allocation8 + $0x20] sm:$0xff] %v538_v50  ;;  %586 = vst [vmem:[#allocation8 + $0xa0] sm:$0xff] %v554_v51  ;;  %v206_v52 = vpop.f32.mrb[10].mxu0  ;;  %v302_v53 = vpop.f32.mrb[10].mxu1 }
 0x133   :  { %v710_v54 = vpack.c.bf16 %v206_v52, %v200_v46  ;;  %v750_v55 = vpack.c.bf16 %v302_v53, %v296_v47  ;;  %v208_v56 = vpop.f32.mrb[11].mxu0  ;;  %v304_v57 = vpop.f32.mrb[11].mxu1 }
 0x134   :  { %v539_v58 = vadd.f32 %v1045_v18, %v208_v56  ;;  %v555_v59 = vadd.f32 %v1045_v18, %v304_v57 }
 0x135   :  { %778 = vst [vmem:[#allocation7 + $0x10] sm:$0xff] %v710_v54   ;;  %786 = vst [vmem:[#allocation7 + $0x50] sm:$0xff] %v750_v55  }
 0x136   :  { %571 = vst [vmem:[#allocation8 + $0x28] sm:$0xff] %v539_v58  ;;  %587 = vst [vmem:[#allocation8 + $0xa8] sm:$0xff] %v555_v59  ;;  %v212_v60 = vpop.f32.mrb[12].mxu0  ;;  %v308_v61 = vpop.f32.mrb[12].mxu1 }
 0x137   :  { %v214_v62 = vpop.f32.mrb[13].mxu0  ;;  %v310_v63 = vpop.f32.mrb[13].mxu1 }
 0x138   :  { %v540_v1 = vadd.f32 %v1045_v18, %v214_v62  ;;  %v556_v2 = vadd.f32 %v1045_v18, %v310_v63 }
 0x13a   :  { %572 = vst [vmem:[#allocation8 + $0x30] sm:$0xff] %v540_v1  ;;  %588 = vst [vmem:[#allocation8 + $0xb0] sm:$0xff] %v556_v2  ;;  %v218_v3 = vpop.f32.mrb[14].mxu0  ;;  %v314_v4 = vpop.f32.mrb[14].mxu1 }
 0x13b   :  { %v715_v5 = vpack.c.bf16 %v218_v3, %v212_v60  ;;  %v755_v6 = vpack.c.bf16 %v314_v4, %v308_v61  ;;  %v220_v7 = vpop.f32.mrb[15].mxu0  ;;  %v316_v8 = vpop.f32.mrb[15].mxu1 }
 0x13c   :  { %v541_v9 = vadd.f32 %v1045_v18, %v220_v7  ;;  %v557_v10 = vadd.f32 %v1045_v18, %v316_v8 }
 0x13d   :  { %779 = vst [vmem:[#allocation7 + $0x18] sm:$0xff] %v715_v5   ;;  %787 = vst [vmem:[#allocation7 + $0x58] sm:$0xff] %v755_v6  }
 0x13e   :  { %573 = vst [vmem:[#allocation8 + $0x38] sm:$0xff] %v541_v9  ;;  %589 = vst [vmem:[#allocation8 + $0xb8] sm:$0xff] %v557_v10  ;;  %v224_v11 = vpop.f32.mrb[16].mxu0  ;;  %v320_v12 = vpop.f32.mrb[16].mxu1 }
 0x13f   :  { %v226_v13 = vpop.f32.mrb[17].mxu0  ;;  %v322_v14 = vpop.f32.mrb[17].mxu1 }
 0x140   :  { %v542_v15 = vadd.f32 %v1045_v18, %v226_v13  ;;  %v558_v16 = vadd.f32 %v1045_v18, %v322_v14 }
 0x142   :  { %574 = vst [vmem:[#allocation8 + $0x40] sm:$0xff] %v542_v15  ;;  %590 = vst [vmem:[#allocation8 + $0xc0] sm:$0xff] %v558_v16  ;;  %v230_v17 = vpop.f32.mrb[18].mxu0  ;;  %v326_v19 = vpop.f32.mrb[18].mxu1 }
 0x143   :  { %v720_v20 = vpack.c.bf16 %v230_v17, %v224_v11  ;;  %v760_v21 = vpack.c.bf16 %v326_v19, %v320_v12  ;;  %v232_v22 = vpop.f32.mrb[19].mxu0  ;;  %v328_v23 = vpop.f32.mrb[19].mxu1 }
 0x144   :  { %v543_v24 = vadd.f32 %v1045_v18, %v232_v22  ;;  %v559_v0 = vadd.f32 %v1045_v18, %v328_v23 }
 0x145   :  { %780 = vst [vmem:[#allocation7 + $0x20] sm:$0xff] %v720_v20   ;;  %788 = vst [vmem:[#allocation7 + $0x60] sm:$0xff] %v760_v21  }
 0x146   :  { %575 = vst [vmem:[#allocation8 + $0x48] sm:$0xff] %v543_v24  ;;  %591 = vst [vmem:[#allocation8 + $0xc8] sm:$0xff] %v559_v0  ;;  %v236_v25 = vpop.f32.mrb[20].mxu0  ;;  %v332_v26 = vpop.f32.mrb[20].mxu1 }
 0x147   :  { %v238_v27 = vpop.f32.mrb[21].mxu0  ;;  %v334_v28 = vpop.f32.mrb[21].mxu1 }
 0x148   :  { %v544_v29 = vadd.f32 %v1045_v18, %v238_v27  ;;  %v560_v30 = vadd.f32 %v1045_v18, %v334_v28 }
 0x14a   :  { %576 = vst [vmem:[#allocation8 + $0x50] sm:$0xff] %v544_v29  ;;  %592 = vst [vmem:[#allocation8 + $0xd0] sm:$0xff] %v560_v30  ;;  %v242_v31 = vpop.f32.mrb[22].mxu0  ;;  %v338_v32 = vpop.f32.mrb[22].mxu1 }
 0x14b   :  { %v725_v33 = vpack.c.bf16 %v242_v31, %v236_v25  ;;  %v765_v34 = vpack.c.bf16 %v338_v32, %v332_v26  ;;  %v244_v35 = vpop.f32.mrb[23].mxu0  ;;  %v340_v36 = vpop.f32.mrb[23].mxu1 }
 0x14c   :  { %v545_v37 = vadd.f32 %v1045_v18, %v244_v35  ;;  %v561_v38 = vadd.f32 %v1045_v18, %v340_v36 }
 0x14d   :  { %781 = vst [vmem:[#allocation7 + $0x28] sm:$0xff] %v725_v33   ;;  %789 = vst [vmem:[#allocation7 + $0x68] sm:$0xff] %v765_v34  }
 0x14e   :  { %577 = vst [vmem:[#allocation8 + $0x58] sm:$0xff] %v545_v37  ;;  %593 = vst [vmem:[#allocation8 + $0xd8] sm:$0xff] %v561_v38  ;;  %v248_v39 = vpop.f32.mrb[24].mxu0  ;;  %v344_v40 = vpop.f32.mrb[24].mxu1 }
 0x14f   :  { %v250_v41 = vpop.f32.mrb[25].mxu0  ;;  %v346_v42 = vpop.f32.mrb[25].mxu1 }
 0x150   :  { %v546_v43 = vadd.f32 %v1045_v18, %v250_v41  ;;  %v562_v44 = vadd.f32 %v1045_v18, %v346_v42 }
 0x152   :  { %578 = vst [vmem:[#allocation8 + $0x60] sm:$0xff] %v546_v43  ;;  %594 = vst [vmem:[#allocation8 + $0xe0] sm:$0xff] %v562_v44  ;;  %v254_v45 = vpop.f32.mrb[26].mxu0  ;;  %v350_v46 = vpop.f32.mrb[26].mxu1 }
 0x153   :  { %v730_v47 = vpack.c.bf16 %v254_v45, %v248_v39  ;;  %v770_v48 = vpack.c.bf16 %v350_v46, %v344_v40  ;;  %v256_v49 = vpop.f32.mrb[27].mxu0  ;;  %v352_v50 = vpop.f32.mrb[27].mxu1 }
 0x154   :  { %v547_v51 = vadd.f32 %v1045_v18, %v256_v49  ;;  %v563_v52 = vadd.f32 %v1045_v18, %v352_v50 }
 0x155   :  { %782 = vst [vmem:[#allocation7 + $0x30] sm:$0xff] %v730_v47   ;;  %790 = vst [vmem:[#allocation7 + $0x70] sm:$0xff] %v770_v48  }
 0x156   :  { %579 = vst [vmem:[#allocation8 + $0x68] sm:$0xff] %v547_v51  ;;  %595 = vst [vmem:[#allocation8 + $0xe8] sm:$0xff] %v563_v52  ;;  %v260_v53 = vpop.f32.mrb[28].mxu0  ;;  %v356_v54 = vpop.f32.mrb[28].mxu1 }
 0x157   :  { %v262_v55 = vpop.f32.mrb[29].mxu0  ;;  %v358_v56 = vpop.f32.mrb[29].mxu1 }
 0x158   :  { %v548_v57 = vadd.f32 %v1045_v18, %v262_v55  ;;  %v564_v58 = vadd.f32 %v1045_v18, %v358_v56 }
 0x15a   :  { %580 = vst [vmem:[#allocation8 + $0x70] sm:$0xff] %v548_v57  ;;  %596 = vst [vmem:[#allocation8 + $0xf0] sm:$0xff] %v564_v58  ;;  %v266_v59 = vpop.f32.mrb[30].mxu0  ;;  %v362_v60 = vpop.f32.mrb[30].mxu1 }
 0x15b   :  { %v735_v61 = vpack.c.bf16 %v266_v59, %v260_v53  ;;  %v775_v62 = vpack.c.bf16 %v362_v60, %v356_v54  ;;  %v268_v63 = vpop.f32.mrb[31].mxu0  ;;  %v364_v1 = vpop.f32.mrb[31].mxu1 }
 0x15c   :  { %v549_v2 = vadd.f32 %v1045_v18, %v268_v63  ;;  %v565_v3 = vadd.f32 %v1045_v18, %v364_v1 }
 0x15d   :  { %783 = vst [vmem:[#allocation7 + $0x38] sm:$0xff] %v735_v61   ;;  %791 = vst [vmem:[#allocation7 + $0x78] sm:$0xff] %v775_v62  }
 0x15e   :  { %581 = vst [vmem:[#allocation8 + $0x78] sm:$0xff] %v549_v2  ;;  %597 = vst [vmem:[#allocation8 + $0xf8] sm:$0xff] %v565_v3 }
 0x15f   :  { %906 = shalt.err (!%p903_p6)
}
 0x160   :  { %s907_s23 = scalar_lea.hbm %s1123_s3, 2048 }
 0x161   :  { %p908_p7 = scmp.ne.s32.totalorder %s1123_s3, %s907_s23  ;;  %p911_p8 = scmp.lt.u32.totalorder %s907_s23, %s1123_s3 }
 0x163   :  { %p913_p9 = pnand %p911_p8, %p908_p7 }
 0x165   :  { %916 = shalt.err (!%p913_p9)
}
 0x166   :  { %s956_s30 = smov 64   ;;  %s957_s5 = smov 4  }
 0x167   :  { %609 = dma.vmem_to_hbm [thread:$0]  %s1077_s17, 2048, %s1123_s3, [#allocation4], %s956_s30, %s956_s30, %s957_s5  }
 0x168   :  { %s917_s8 = scalar_lea.vmem %s1081_s19, 4096  ;;  %p922_p11 = scmp.lt.s32.totalorder %s1081_s19, %s1081_s19 }
 0x169   :  { %p918_p10 = scmp.ne.s32.totalorder %s1081_s19, %s917_s8  ;;  %p923_p12 = scmp.lt.s32.totalorder %s917_s8, %s917_s8 }
 0x16b   :  { %p924_p13 = por %p923_p12, %p922_p11 }
 0x16d   :  { %p925_p0 = pnand %p924_p13, %p918_p10 }
 0x16f   :  { %928 = shalt.err (!%p925_p0)
}
 0x170   :  { %s929_s11 = scalar_lea.hbm %s1124_s4, 4096 }
 0x171   :  { %p930_p1 = scmp.ne.s32.totalorder %s1124_s4, %s929_s11  ;;  %p933_p2 = scmp.lt.u32.totalorder %s929_s11, %s1124_s4 }
 0x173   :  { %p935_p3 = pnand %p933_p2, %p930_p1 }
 0x175   :  { %938 = shalt.err (!%p935_p3)
}
 0x176   :  { %621 = dma.vmem_to_hbm [thread:$0]  %s1081_s19, 4096, %s1124_s4, [#allocation9], %s948_s25, %s948_s25, %s949_s26  }
 0x177   :  { %943 = dma.done.wait [#allocation4], 2048  }
 0x178   :  { %944 = vsyncadd [#allocation4], 4294965248 }
 0x179   :  { %945 = dma.done.wait [#allocation9], 4096  }
 0x17a   :  { %946 = vsyncadd [#allocation9], 4294963200 }
 0x17b   :  { %628 = vsyncpa [#allocation3], 1 }
 0x17c   :  { %629 = vsyncpa [#allocation6], 1 }
 0x17d   :  { %630 = vsyncpa [#allocation4], 1 }
 0x17e   :  { %631 = vsyncpa [#allocation9], 1 }

</bundles_post_ra>
